<compile_context>
chip_gen: v7x
topology: tpu7x:2x2x1
jax: 0.10.0
libtpu: 0.0.40
codegen_flags: <defaults>
</compile_context>

<pallas_src>
import jax
import jax.numpy as jnp
from jax.experimental import pallas as pl
from jax.experimental.pallas import tpu as pltpu


def _round_up(x, m):
    return ((x + m - 1) // m) * m


def _dc_lc_stats_kernel(x_ref, t_ref, loc_fp_ref, loc_fn_ref, stats_ref):
    h = pl.program_id(1)

    x = x_ref[0].astype(jnp.float32)            # [C, TH, W] logits (f32 compute)
    lab = t_ref[0, 0]                           # [TH, W] int32 class labels
    C, TH, W = x.shape
    SEC = _round_up(C, 8)                       # sublane-aligned section stride

    cidx = jax.lax.broadcasted_iota(jnp.int32, (C, TH, W), 0)
    yoh = (cidx == lab[None, :, :]).astype(jnp.float32)        # one-hot target

    # ---- softmax over the channel axis (axis 0) ----
    m = jnp.max(x, axis=0, keepdims=True)       # [1, TH, W]
    d = x - m
    e = jnp.exp(d)
    s = jnp.sum(e, axis=0, keepdims=True)       # [1, TH, W]
    inv_s = pl.reciprocal(s, approx=False)      # 1 EUP recip instead of C divides
    p = e * inv_s                               # softmax probabilities

    # ---- cross-entropy per pixel without materializing log-softmax ----
    #   -log p[target] = log(sum exp) - d[target]   (one-hot sums to 1 over C)
    sel = jnp.sum(d * yoh, axis=0)              # [TH, W]
    ce_pix = jnp.log(s[0]) - sel                # [TH, W]

    # ---- dice partials: reduce over the H tile only, keep W lanes ----
    #   fp = sum(p) - tp ;  fn = sum(yoh) - tp   (finished on the host)
    tp_w = jnp.sum(p * yoh, axis=1)             # [C, W]
    p_w = jnp.sum(p, axis=1)                    # [C, W]
    y_w = jnp.sum(yoh, axis=1)                  # [C, W]
    ce_w = jnp.sum(ce_pix, axis=0)              # [W]

    @pl.when(h == 0)
    def _():                                    # zero the accumulator per sample
        stats_ref[...] = jnp.zeros_like(stats_ref)

    stats_ref[0, 0:C, :] += tp_w
    stats_ref[0, SEC:SEC + C, :] += p_w
    stats_ref[0, 2 * SEC:2 * SEC + C, :] += y_w
    stats_ref[0, 3 * SEC:3 * SEC + 1, :] += ce_w[None, :]

    # ---- localization FP / FN (argmax prediction vs one-hot target) ----
    is_max = x == m
    amax = jnp.min(jnp.where(is_max, cidx, jnp.int32(C)),
                   axis=0, keepdims=True)       # first maximal channel, [1, TH, W]
    wrong = (amax != lab[None, :, :]).astype(jnp.float32)      # mispredicted pixel
    poh = (cidx == amax).astype(jnp.float32)                   # predicted one-hot

    fp_val = x * (poh * wrong)       # raw logit of predicted class on FP pixels
    fn_val = yoh * wrong             # target one-hot on mispredicted pixels
    loc_fp_ref[0] = jnp.sum(fp_val, axis=2)     # [C, TH]  (sum over W)
    loc_fn_ref[0] = jnp.sum(fn_val, axis=2)     # [C, TH]


def dc_lc_stats(net_output, target_labels):
    """Pallas kernel wrapper. Returns localization partials and packed dice/CE stats."""
    N, C, H, W = net_output.shape
    TH = 128 if H % 128 == 0 else H             # H-tile: lane-dense loc output
    SEC = _round_up(C, 8)
    SROWS = 3 * SEC + 8                         # tp | sum_p | sum_y | ce sections

    out_shape = (
        jax.ShapeDtypeStruct((N, C, H), jnp.float32),       # loc FP (sum over W)
        jax.ShapeDtypeStruct((N, C, H), jnp.float32),       # loc FN (sum over W)
        jax.ShapeDtypeStruct((N, SROWS, W), jnp.float32),   # packed dice/CE partials
    )
    grid_spec = pltpu.PrefetchScalarGridSpec(
        num_scalar_prefetch=0,
        grid=(N, H // TH),
        in_specs=[
            pl.BlockSpec((1, C, TH, W), lambda n, h: (n, 0, h, 0)),
            pl.BlockSpec((1, 1, TH, W), lambda n, h: (n, 0, h, 0)),
        ],
        out_specs=[
            pl.BlockSpec((1, C, TH), lambda n, h: (n, 0, h)),
            pl.BlockSpec((1, C, TH), lambda n, h: (n, 0, h)),
            pl.BlockSpec((1, SROWS, W), lambda n, h: (n, 0, 0)),  # accumulator over h
        ],
    )
    return pl.pallas_call(
        _dc_lc_stats_kernel,
        out_shape=out_shape,
        grid_spec=grid_spec,
        compiler_params=pltpu.CompilerParams(
            dimension_semantics=("parallel", "arbitrary")),
    )(net_output, target_labels.astype(jnp.int32))   # no f32 upcast: bf16 passes through


def dc_and_lc_loss(net_output, target, *,
                   weight_ce=1.0, weight_dice=1.0, dice_smooth=1e-5,
                   alpha=0.01, loc_alpha=0.1, loc_eps=1e-5):
    """Forward pass of DC_and_LC_loss (4-D / 2-D image case)."""
    N, C, H, W = net_output.shape
    SEC = _round_up(C, 8)
    loc_fp, loc_fn, stats = dc_lc_stats(net_output, target)

    tp_cw = stats[:, 0:C]                     # [N, C, W]
    p_cw = stats[:, SEC:SEC + C]              # [N, C, W]
    y_cw = stats[:, 2 * SEC:2 * SEC + C]      # [N, C, W]
    ce_w = stats[:, 3 * SEC]                  # [N, W]

    # ---- DC_and_CE_loss: SoftDice(batch_dice=True, do_bg=False) + CE ----
    tp = jnp.sum(tp_cw, axis=(0, 2))          # [C]  (batch_dice -> sum over N too)
    fp = jnp.sum(p_cw, axis=(0, 2)) - tp
    fn = jnp.sum(y_cw, axis=(0, 2)) - tp
    nominator = 2.0 * tp + dice_smooth
    denominator = 2.0 * tp + fp + fn + dice_smooth
    dc = nominator / (denominator + 1e-8)
    dc_loss = -jnp.mean(dc[1:])               # do_bg=False, log_dice=False
    ce_loss = jnp.sum(ce_w) / (N * H * W)
    dc_ce = weight_ce * ce_loss + weight_dice * dc_loss    # aggregate='sum'

    # ---- LocalizationLoss (only i==1 branch is active for 4-D input) ----
    dim_pred = loc_fp[:, 1:, :]               # [N, C-1, H]
    dim_lab = loc_fn[:, 1:, :]
    dist_pred = jnp.cumsum(dim_pred, axis=-1) / (
        jnp.sum(dim_pred, axis=-1, keepdims=True) + loc_eps)
    dist_lab = jnp.cumsum(dim_lab, axis=-1) / (
        jnp.sum(dim_lab, axis=-1, keepdims=True) + loc_eps)
    dim_loss = jnp.mean(jnp.abs(dist_pred - dist_lab)) * jnp.sqrt(jnp.float32(H))
    mean_fp = jnp.sum(dim_pred, axis=-1) / (H * W)   # mean over H*W of fp[:, 1:]
    mean_fn = jnp.sum(dim_lab, axis=-1) / (H * W)
    l1_reg = jnp.mean(jnp.abs(mean_fp - (-mean_fn)))  # nn.L1Loss(mean_fp, -mean_fn)
    lc_loss = dim_loss + loc_alpha * l1_reg

    return dc_ce + alpha * lc_loss


# ---------------- pure-JAX reference (numerical sanity check) ----------------
def ref_dc_and_lc_loss(net_output, target, *, dice_smooth=1e-5,
                       alpha=0.01, loc_alpha=0.1, loc_eps=1e-5):
    N, C, H, W = net_output.shape
    lab = target[:, 0]
    yoh = jax.nn.one_hot(lab, C, axis=1, dtype=jnp.float32)
    p = jax.nn.softmax(net_output, axis=1)
    logp = jax.nn.log_softmax(net_output, axis=1)
    tp = jnp.sum(p * yoh, axis=(0, 2, 3))
    fp = jnp.sum(p * (1 - yoh), axis=(0, 2, 3))
    fn = jnp.sum((1 - p) * yoh, axis=(0, 2, 3))
    dc = (2 * tp + dice_smooth) / (2 * tp + fp + fn + dice_smooth + 1e-8)
    dc_loss = -jnp.mean(dc[1:])
    ce_loss = jnp.mean(-jnp.take_along_axis(logp, lab[:, None], axis=1))
    dc_ce = ce_loss + dc_loss

    amax = jnp.argmax(net_output, axis=1)
    poh = jax.nn.one_hot(amax, C, axis=1, dtype=jnp.float32)
    fp_val = net_output * (poh * (1 - yoh))
    fn_val = yoh * ((1 - poh) * yoh)
    dim_pred = jnp.sum(fp_val[:, 1:], axis=-1)
    dim_lab = jnp.sum(fn_val[:, 1:], axis=-1)
    dist_pred = jnp.cumsum(dim_pred, -1) / (jnp.sum(dim_pred, -1, keepdims=True) + loc_eps)
    dist_lab = jnp.cumsum(dim_lab, -1) / (jnp.sum(dim_lab, -1, keepdims=True) + loc_eps)
    dim_loss = jnp.mean(jnp.abs(dist_pred - dist_lab)) * jnp.sqrt(jnp.float32(H))
    mean_fp = jnp.mean(fp_val[:, 1:].reshape(N, C - 1, -1), axis=-1)
    mean_fn = jnp.mean(fn_val[:, 1:].reshape(N, C - 1, -1), axis=-1)
    l1 = jnp.mean(jnp.abs(mean_fp - (-mean_fn)))
    lc = dim_loss + loc_alpha * l1
    return dc_ce + alpha * lc


if __name__ == "__main__":
    key = jax.random.PRNGKey(0)
    # Small case (TH falls back to full H) + a tiled case (H=256 -> 2 H-tiles,
    # exercises the @pl.when(h==0) accumulator path).
    for (N, C, H, W) in ((2, 4, 16, 16), (2, 4, 256, 128)):
        k1, k2 = jax.random.split(jax.random.fold_in(key, H))
        net_output = jax.random.normal(k1, (N, C, H, W), dtype=jnp.float32)
        target = jax.random.randint(k2, (N, 1, H, W), 0, C, dtype=jnp.int32)

        loss = jax.block_until_ready(dc_and_lc_loss(net_output, target))
        ref = jax.block_until_ready(ref_dc_and_lc_loss(net_output, target))
        assert jnp.isfinite(loss), loss
        assert jnp.allclose(loss, ref, rtol=1e-3, atol=1e-4), (loss, ref, (N, C, H, W))
    print("KERNEL_OK")
</pallas_src>

<mosaic_0001>
module attributes {stable_mosaic.version = 11 : i64} {
  func.func @_dc_lc_stats_kernel(%arg0: i32, %arg1: i32, %arg2: memref<1x4x16x16xf32, #tpu.memory_space<vmem>>, %arg3: memref<1x1x16x16xi32, #tpu.memory_space<vmem>>, %arg4: memref<1x4x16xf32, #tpu.memory_space<vmem>>, %arg5: memref<1x4x16xf32, #tpu.memory_space<vmem>>, %arg6: memref<1x32x16xf32, #tpu.memory_space<vmem>>) attributes {dimension_semantics = [#tpu.dimension_semantics<parallel>, #tpu.dimension_semantics<arbitrary>], iteration_bounds = array<i64: 2, 1>, scalar_prefetch = 0 : i64, scratch_operands = 0 : i64, tpu.core_type = #tpu.core_type<tc>, window_params = [{transform_indices = @transform_0, window_bounds = array<i64: 1, 4, 16, 16>}, {transform_indices = @transform_1, window_bounds = array<i64: 1, 1, 16, 16>}, {transform_indices = @transform_2, window_bounds = array<i64: 1, 4, 16>}, {transform_indices = @transform_3, window_bounds = array<i64: 1, 4, 16>}, {transform_indices = @transform_4, window_bounds = array<i64: 1, 32, 16>}]} {
    %c0 = arith.constant 0 : index
    %c0_0 = arith.constant 0 : index
    %c0_1 = arith.constant 0 : index
    %c0_2 = arith.constant 0 : index
    %0 = vector.load %arg2[%c0, %c0_0, %c0_1, %c0_2] : memref<1x4x16x16xf32, #tpu.memory_space<vmem>>, vector<1x4x16x16xf32>
    %1 = vector.shape_cast %0 : vector<1x4x16x16xf32> to vector<4x16x16xf32>
    %c0_3 = arith.constant 0 : index
    %c0_4 = arith.constant 0 : index
    %c0_5 = arith.constant 0 : index
    %c0_6 = arith.constant 0 : index
    %2 = vector.load %arg3[%c0_3, %c0_4, %c0_5, %c0_6] : memref<1x1x16x16xi32, #tpu.memory_space<vmem>>, vector<1x1x16x16xi32>
    %3 = vector.shape_cast %2 : vector<1x1x16x16xi32> to vector<16x16xi32>
    %4 = tpu.iota {dimensions = array<i32: 0>} : vector<4x16x16xi32>
    %5 = vector.shape_cast %3 : vector<16x16xi32> to vector<1x16x16xi32>
    %6 = vector.broadcast %5 : vector<1x16x16xi32> to vector<4x16x16xi32>
    %7 = arith.cmpi eq, %4, %6 : vector<4x16x16xi32>
    %8 = arith.extui %7 : vector<4x16x16xi1> to vector<4x16x16xi32>
    %9 = arith.sitofp %8 : vector<4x16x16xi32> to vector<4x16x16xf32>
    %cst = arith.constant dense<0xFF800000> : vector<16x16xf32>
    %10 = vector.multi_reduction <maximumf>, %1, %cst [0] : vector<4x16x16xf32> to vector<16x16xf32>
    %11 = vector.shape_cast %10 : vector<16x16xf32> to vector<1x16x16xf32>
    %12 = vector.broadcast %11 : vector<1x16x16xf32> to vector<4x16x16xf32>
    %13 = arith.subf %1, %12 : vector<4x16x16xf32>
    %14 = math.exp %13 : vector<4x16x16xf32>
    %cst_7 = arith.constant dense<0.000000e+00> : vector<16x16xf32>
    %15 = vector.multi_reduction <add>, %14, %cst_7 [0] : vector<4x16x16xf32> to vector<16x16xf32>
    %16 = vector.shape_cast %15 : vector<16x16xf32> to vector<1x16x16xf32>
    %17 = tpu.reciprocal %16 : vector<1x16x16xf32> -> vector<1x16x16xf32>
    %18 = vector.broadcast %17 : vector<1x16x16xf32> to vector<4x16x16xf32>
    %19 = arith.mulf %14, %18 : vector<4x16x16xf32>
    %20 = arith.mulf %13, %9 : vector<4x16x16xf32>
    %cst_8 = arith.constant dense<0.000000e+00> : vector<16x16xf32>
    %21 = vector.multi_reduction <add>, %20, %cst_8 [0] : vector<4x16x16xf32> to vector<16x16xf32>
    %22 = vector.shape_cast %16 : vector<1x16x16xf32> to vector<16x16xf32>
    %23 = math.log %22 : vector<16x16xf32>
    %24 = arith.subf %23, %21 : vector<16x16xf32>
    %25 = arith.mulf %19, %9 : vector<4x16x16xf32>
    %cst_9 = arith.constant dense<0.000000e+00> : vector<4x16xf32>
    %26 = vector.multi_reduction <add>, %25, %cst_9 [1] : vector<4x16x16xf32> to vector<4x16xf32>
    %cst_10 = arith.constant dense<0.000000e+00> : vector<4x16xf32>
    %27 = vector.multi_reduction <add>, %19, %cst_10 [1] : vector<4x16x16xf32> to vector<4x16xf32>
    %cst_11 = arith.constant dense<0.000000e+00> : vector<4x16xf32>
    %28 = vector.multi_reduction <add>, %9, %cst_11 [1] : vector<4x16x16xf32> to vector<4x16xf32>
    %cst_12 = arith.constant dense<0.000000e+00> : vector<16xf32>
    %29 = vector.multi_reduction <add>, %24, %cst_12 [0] : vector<16x16xf32> to vector<16xf32>
    %c0_i32 = arith.constant 0 : i32
    %30 = arith.cmpi eq, %arg1, %c0_i32 : i32
    %31 = arith.extui %30 : i1 to i32
    %c0_i32_13 = arith.constant 0 : i32
    %32 = arith.cmpi ne, %31, %c0_i32_13 : i32
    scf.if %32 {
      %cst_44 = arith.constant 0.000000e+00 : f32
      %85 = vector.broadcast %cst_44 : f32 to vector<1x32x16xf32>
      %c0_45 = arith.constant 0 : index
      %c0_46 = arith.constant 0 : index
      %c0_47 = arith.constant 0 : index
      %86 = vector.load %arg6[%c0_45, %c0_46, %c0_47] : memref<1x32x16xf32, #tpu.memory_space<vmem>>, vector<1x32x16xf32>
      tpu.vector_store %arg6[%c0_45, %c0_46, %c0_47], %85 {strides = array<i32>} : memref<1x32x16xf32, #tpu.memory_space<vmem>>, vector<1x32x16xf32>,
    } else {
    }
    %c0_14 = arith.constant 0 : index
    %c0_15 = arith.constant 0 : index
    %c0_16 = arith.constant 0 : index
    %33 = vector.load %arg6[%c0_14, %c0_15, %c0_16] : memref<1x32x16xf32, #tpu.memory_space<vmem>>, vector<1x4x16xf32>
    %34 = vector.shape_cast %33 : vector<1x4x16xf32> to vector<4x16xf32>
    %35 = arith.addf %34, %26 : vector<4x16xf32>
    %c0_17 = arith.constant 0 : index
    %c0_18 = arith.constant 0 : index
    %c0_19 = arith.constant 0 : index
    %36 = vector.load %arg6[%c0_17, %c0_18, %c0_19] : memref<1x32x16xf32, #tpu.memory_space<vmem>>, vector<1x4x16xf32>
    %37 = vector.shape_cast %36 : vector<1x4x16xf32> to vector<4x16xf32>
    %38 = vector.shape_cast %35 : vector<4x16xf32> to vector<1x4x16xf32>
    tpu.vector_store %arg6[%c0_17, %c0_18, %c0_19], %38 {strides = array<i32>} : memref<1x32x16xf32, #tpu.memory_space<vmem>>, vector<1x4x16xf32>,
    %c0_20 = arith.constant 0 : index
    %c8 = arith.constant 8 : index
    %c0_21 = arith.constant 0 : index
    %39 = vector.load %arg6[%c0_20, %c8, %c0_21] : memref<1x32x16xf32, #tpu.memory_space<vmem>>, vector<1x4x16xf32>
    %40 = vector.shape_cast %39 : vector<1x4x16xf32> to vector<4x16xf32>
    %41 = arith.addf %40, %27 : vector<4x16xf32>
    %c0_22 = arith.constant 0 : index
    %c8_23 = arith.constant 8 : index
    %c0_24 = arith.constant 0 : index
    %42 = vector.load %arg6[%c0_22, %c8_23, %c0_24] : memref<1x32x16xf32, #tpu.memory_space<vmem>>, vector<1x4x16xf32>
    %43 = vector.shape_cast %42 : vector<1x4x16xf32> to vector<4x16xf32>
    %44 = vector.shape_cast %41 : vector<4x16xf32> to vector<1x4x16xf32>
    tpu.vector_store %arg6[%c0_22, %c8_23, %c0_24], %44 {strides = array<i32>} : memref<1x32x16xf32, #tpu.memory_space<vmem>>, vector<1x4x16xf32>,
    %c0_25 = arith.constant 0 : index
    %c16 = arith.constant 16 : index
    %c0_26 = arith.constant 0 : index
    %45 = vector.load %arg6[%c0_25, %c16, %c0_26] : memref<1x32x16xf32, #tpu.memory_space<vmem>>, vector<1x4x16xf32>
    %46 = vector.shape_cast %45 : vector<1x4x16xf32> to vector<4x16xf32>
    %47 = arith.addf %46, %28 : vector<4x16xf32>
    %c0_27 = arith.constant 0 : index
    %c16_28 = arith.constant 16 : index
    %c0_29 = arith.constant 0 : index
    %48 = vector.load %arg6[%c0_27, %c16_28, %c0_29] : memref<1x32x16xf32, #tpu.memory_space<vmem>>, vector<1x4x16xf32>
    %49 = vector.shape_cast %48 : vector<1x4x16xf32> to vector<4x16xf32>
    %50 = vector.shape_cast %47 : vector<4x16xf32> to vector<1x4x16xf32>
    tpu.vector_store %arg6[%c0_27, %c16_28, %c0_29], %50 {strides = array<i32>} : memref<1x32x16xf32, #tpu.memory_space<vmem>>, vector<1x4x16xf32>,
    %c0_30 = arith.constant 0 : index
    %c24 = arith.constant 24 : index
    %c0_31 = arith.constant 0 : index
    %51 = vector.load %arg6[%c0_30, %c24, %c0_31] : memref<1x32x16xf32, #tpu.memory_space<vmem>>, vector<1x1x16xf32>
    %52 = vector.shape_cast %51 : vector<1x1x16xf32> to vector<1x16xf32>
    %53 = vector.shape_cast %29 : vector<16xf32> to vector<1x16xf32>
    %54 = arith.addf %52, %53 : vector<1x16xf32>
    %c0_32 = arith.constant 0 : index
    %c24_33 = arith.constant 24 : index
    %c0_34 = arith.constant 0 : index
    %55 = vector.load %arg6[%c0_32, %c24_33, %c0_34] : memref<1x32x16xf32, #tpu.memory_space<vmem>>, vector<1x1x16xf32>
    %56 = vector.shape_cast %55 : vector<1x1x16xf32> to vector<1x16xf32>
    %57 = vector.shape_cast %54 : vector<1x16xf32> to vector<1x1x16xf32>
    tpu.vector_store %arg6[%c0_32, %c24_33, %c0_34], %57 {strides = array<i32>} : memref<1x32x16xf32, #tpu.memory_space<vmem>>, vector<1x1x16xf32>,
    %58 = vector.broadcast %11 : vector<1x16x16xf32> to vector<4x16x16xf32>
    %59 = arith.cmpf oeq, %1, %58 : vector<4x16x16xf32>
    %c4_i32 = arith.constant 4 : i32
    %60 = vector.broadcast %c4_i32 : i32 to vector<4x16x16xi32>
    %61 = arith.select %59, %4, %60 : vector<4x16x16xi1>, vector<4x16x16xi32>
    %cst_35 = arith.constant dense<2147483647> : vector<16x16xi32>
    %62 = vector.multi_reduction <minsi>, %61, %cst_35 [0] : vector<4x16x16xi32> to vector<16x16xi32>
    %63 = vector.shape_cast %62 : vector<16x16xi32> to vector<1x16x16xi32>
    %64 = vector.shape_cast %3 : vector<16x16xi32> to vector<1x16x16xi32>
    %65 = arith.cmpi ne, %63, %64 : vector<1x16x16xi32>
    %66 = arith.extui %65 : vector<1x16x16xi1> to vector<1x16x16xi32>
    %67 = arith.sitofp %66 : vector<1x16x16xi32> to vector<1x16x16xf32>
    %68 = vector.broadcast %63 : vector<1x16x16xi32> to vector<4x16x16xi32>
    %69 = arith.cmpi eq, %4, %68 : vector<4x16x16xi32>
    %70 = arith.extui %69 : vector<4x16x16xi1> to vector<4x16x16xi32>
    %71 = arith.sitofp %70 : vector<4x16x16xi32> to vector<4x16x16xf32>
    %72 = vector.broadcast %67 : vector<1x16x16xf32> to vector<4x16x16xf32>
    %73 = arith.mulf %71, %72 : vector<4x16x16xf32>
    %74 = arith.mulf %1, %73 : vector<4x16x16xf32>
    %75 = vector.broadcast %67 : vector<1x16x16xf32> to vector<4x16x16xf32>
    %76 = arith.mulf %9, %75 : vector<4x16x16xf32>
    %cst_36 = arith.constant dense<0.000000e+00> : vector<4x16xf32>
    %77 = vector.multi_reduction <add>, %74, %cst_36 [2] : vector<4x16x16xf32> to vector<4x16xf32>
    %c0_37 = arith.constant 0 : index
    %c0_38 = arith.constant 0 : index
    %c0_39 = arith.constant 0 : index
    %78 = vector.load %arg4[%c0_37, %c0_38, %c0_39] : memref<1x4x16xf32, #tpu.memory_space<vmem>>, vector<1x4x16xf32>
    %79 = vector.shape_cast %78 : vector<1x4x16xf32> to vector<4x16xf32>
    %80 = vector.shape_cast %77 : vector<4x16xf32> to vector<1x4x16xf32>
    tpu.vector_store %arg4[%c0_37, %c0_38, %c0_39], %80 {strides = array<i32>} : memref<1x4x16xf32, #tpu.memory_space<vmem>>, vector<1x4x16xf32>,
    %cst_40 = arith.constant dense<0.000000e+00> : vector<4x16xf32>
    %81 = vector.multi_reduction <add>, %76, %cst_40 [2] : vector<4x16x16xf32> to vector<4x16xf32>
    %c0_41 = arith.constant 0 : index
    %c0_42 = arith.constant 0 : index
    %c0_43 = arith.constant 0 : index
    %82 = vector.load %arg5[%c0_41, %c0_42, %c0_43] : memref<1x4x16xf32, #tpu.memory_space<vmem>>, vector<1x4x16xf32>
    %83 = vector.shape_cast %82 : vector<1x4x16xf32> to vector<4x16xf32>
    %84 = vector.shape_cast %81 : vector<4x16xf32> to vector<1x4x16xf32>
    tpu.vector_store %arg5[%c0_41, %c0_42, %c0_43], %84 {strides = array<i32>} : memref<1x4x16xf32, #tpu.memory_space<vmem>>, vector<1x4x16xf32>,
    return
  }
  func.func @transform_0(%arg0: i32, %arg1: i32) -> (i32, i32, i32, i32) {
    %c0_i32 = arith.constant 0 : i32
    %c0_i32_0 = arith.constant 0 : i32
    %c0_i32_1 = arith.constant 0 : i32
    return %arg0, %c0_i32, %arg1, %c0_i32_0 : i32, i32, i32, i32
  }
  func.func @transform_1(%arg0: i32, %arg1: i32) -> (i32, i32, i32, i32) {
    %c0_i32 = arith.constant 0 : i32
    %c0_i32_0 = arith.constant 0 : i32
    %c0_i32_1 = arith.constant 0 : i32
    return %arg0, %c0_i32, %arg1, %c0_i32_0 : i32, i32, i32, i32
  }
  func.func @transform_2(%arg0: i32, %arg1: i32) -> (i32, i32, i32) {
    %c0_i32 = arith.constant 0 : i32
    %c0_i32_0 = arith.constant 0 : i32
    return %arg0, %c0_i32, %arg1 : i32, i32, i32
  }
  func.func @transform_3(%arg0: i32, %arg1: i32) -> (i32, i32, i32) {
    %c0_i32 = arith.constant 0 : i32
    %c0_i32_0 = arith.constant 0 : i32
    return %arg0, %c0_i32, %arg1 : i32, i32, i32
  }
  func.func @transform_4(%arg0: i32, %arg1: i32) -> (i32, i32, i32) {
    %c0_i32 = arith.constant 0 : i32
    %c0_i32_0 = arith.constant 0 : i32
    %c0_i32_1 = arith.constant 0 : i32
    return %arg0, %c0_i32, %c0_i32_0 : i32, i32, i32
  }
}

</mosaic_0001>

<bundles_post_ra>
// kernel: tpu_custom_call.1
= control target key start
LH: loop header
LB: loop body
LE: loop exit
PB: predicated region body
PF: predicated region fallthrough
CT: control target
= control target key end

     0   :  { %10 = vsyncpa [#allocation3], 0  ;;  %s2123_s0 = inlined_call_operand.hbm [shape: f32[2,4,16,16], index: 0, kind: input, shape index: {}]   ;;  %s2124_s1 = inlined_call_operand.hbm [shape: s32[2,1,16,16], index: 1, kind: input, shape index: {}]   ;;  %s2125_s2 = inlined_call_operand.hbm [shape: f32[2,4,16], index: 2, kind: output, shape index: {0}]   ;;  %s2126_s3 = inlined_call_operand.hbm [shape: f32[2,4,16], index: 3, kind: output, shape index: {1}]   ;;  %s2127_s4 = inlined_call_operand.vmem [shape: f32[2,32,16], index: 4, kind: output, shape index: {2}]  }
   0x1   :  { %12 = vsyncpa [#allocation3 + $0x1], 0 }
   0x2   :  { %13 = vsyncpa [#allocation6], 0 }
   0x3   :  { %15 = vsyncpa [#allocation6 + $0x1], 0 }
   0x4   :  { %16 = vsyncpa [#allocation4], 0 }
   0x5   :  { %18 = vsyncpa [#allocation4 + $0x1], 0 }
   0x6   :  { %19 = vsyncpa [#allocation9], 0 }
   0x7   :  { %21 = vsyncpa [#allocation9 + $0x1], 0  ;;  %s1409_s15 = smov 0   ;;  %s1411_s16 = smov 0  }
   0x8   :  { %s1413_s17 = smov 0   ;;  %s1415_s18 = smov 0  }
   0x9   :  { %s1417_s19 = smov 0   ;;  %s1419_s20 = smov 0  }
   0xa LB: > { %s1052_s21 = sadd.s32 4294967295, %s1374_s20   ;;  %s1053_s22 = sadd.s32 4294967294, %s1374_s20   ;;  %s1374_s20 = sphi %s1419_s20, %s27_s20   ;;  %s1370_s19 = sphi %s1417_s19, %s2147_s19   ;;  %s1366_s18 = sphi %s1415_s18, %s2146_s18   ;;  %s1362_s17 = sphi %s1413_s17, %s2145_s17   ;;  %s1358_s16 = sphi %s1411_s16, %s2144_s16   ;;  %s1354_s15 = sphi %s1409_s15, %s2143_s15  }
   0xb   : > { %s39_s23 = sadd.s32 1, %s1370_s19  ;;  %s48_s24 = sadd.s32 1, %s1362_s17 }
   0xc   : > { %p41_p0 = scmp.ge.s32.totalorder %s39_s23, 2  ;;  %p55_p1 = scmp.ne.s32.totalorder %s1362_s17, %s1358_s16 }
   0xd   : > { %p56_p2 = scmp.eq.s32.totalorder %s1374_s20, 0  ;;  %p61_p3 = scmp.ne.s32.totalorder %s1358_s16, %s1354_s15 }
   0xe   : > { %s2149_s23 = smov (%p41_p0, %s39_s23), 0  ;;  %p62_p5 = scmp.eq.s32.totalorder %s1052_s21, 0 }
   0xf   : > { %p1450_p4 = por %p56_p2, %p55_p1  ;;  %s43_s26 = ssub.s32 %s1370_s19, %s2149_s23 }
  0x10   : > { %p115_p6 = scmp.eq.s32.totalorder %s1052_s21, 1  ;;  %p46_p7 = scmp.eq.s32.totalorder %s43_s26, 0 }
  0x11   : > { %p1456_p8 = por %p62_p5, %p61_p3  ;;  %p121_p10 = scmp.eq.s32.totalorder %s1053_s22, 1 }
  0x12   : > { %p1460_p9 = por %p115_p6, %p55_p1  ;;  %p1118_p13 = scmp.lt.s32.totalorder %s1374_s20, 2 }
  0x13   : > { %s2132_s27 = scalar_select %p1456_p8, 1, 0 }
  0x14   : > { %s2133_s28 = scalar_select %p1460_p9, 1, 0 }
  0x15   : > { %s1465_s29 = scalar_select %p46_p7, %s1362_s17, %s48_s24  }
  0x16   : > { %p1467_p11 = por %p121_p10, %p61_p3  ;;  %s1474_s5 = sand.u32 1, %s1362_s17  }
  0x17   : > { %s1056_s6 = sshll.u32 %s1474_s5, 6  ;;  %s1093_s7 = sshll.u32 %s1370_s19, 10 }
  0x18   : > { %s2134_s30 = scalar_select %p1467_p11, 1, 0 }
  0x19   : > { %s1481_s10 = scalar_lea.hbm %s2123_s0, %s1093_s7  ;;  %s199_s11 = scalar_lea.vmem [#allocation2], %s1056_s6 }
  0x1a   : > { %s208_s12 = sshll.u32 %s199_s11, 4  ;;  %p1487_p0 = pnand %p1118_p13, %p1450_p4  ;;  %s1483_s12 = int_to_ptr.vmem [resolvable:$true] %s208_s12 }
  0x1b   : > { %s196_s14 = scalar_lea.sflag [#allocation3], %s1474_s5  ;;  %s1196_s21 = scalar_lea.hbm %s1481_s10, 1024 }
  0x1c   : > { %p1197_p2 = scmp.ne.s32.totalorder %s1481_s10, %s1196_s21  ;;  %p1198_p3 = pneg %p1487_p0 }
  0x1d   : > { %s1201_s25 = scalar_lea.hbm %s2123_s0, 2048  ;;  %p1202_p4 = scmp.lt.u32.totalorder %s1481_s10, %s2123_s0 }
  0x1e   : > { %p1199_p5 = pnand %p1198_p3, %p1197_p2  ;;  %p1203_p7 = scmp.lt.u32.totalorder %s1201_s25, %s1196_s21 }
  0x1f   : > { %p1205_p13 = scmp.lt.u32.totalorder %s1196_s21, %s1481_s10 }
  0x20   : > { %p1200_p6 = pneg %p1199_p5  ;;  %p1204_p10 = por %p1203_p7, %p1202_p4 }
  0x22   : > { %p1206_p12 = por %p1205_p13, %p1204_p10 }
  0x24   : > { %p1207_p1 = pnand %p1206_p12, %p1200_p6 }
  0x26   : > { %1210 = shalt.err (!%p1207_p1)
}
  0x27   : > { %s1211_s7 = scalar_lea.vmem %s1483_s12, 1024  ;;  %s1376_s8 = smov [#allocation2]  }
  0x28   : > { %p1212_p2 = scmp.ne.s32.totalorder %s1483_s12, %s1211_s7  ;;  %s1216_s9 = sshll.u32 %s1376_s8, 4  ;;  %s1217_s9 = int_to_ptr.vmem [resolvable:$false] %s1216_s9 }
  0x29   : > { %s1218_s11 = scalar_lea.vmem %s1217_s9, 2048  ;;  %p1219_p9 = scmp.lt.s32.totalorder %s1483_s12, %s1217_s9 }
  0x2a   : > { %p1214_p5 = pnand %p1212_p2, %p1198_p3  ;;  %p1220_p4 = scmp.lt.s32.totalorder %s1218_s11, %s1211_s7 }
  0x2c   : > { %p1215_p11 = pneg %p1214_p5  ;;  %p1221_p7 = por %p1220_p4, %p1219_p9 }
  0x2e   : > { %p1222_p10 = pnand %p1221_p7, %p1215_p11 }
  0x30   : > { %1225 = shalt.err (!%p1222_p10)
}
  0x31   : > { %s2129_s21 = smov 128   ;;  %s1378_s22 = smov 8  }
  0x32   : > { %1107 = dma.hbm_to_vmem [thread:$0]  (!%p1487_p0), %s1481_s10, 1024, %s1483_s12, %s196_s14, %s2129_s21, %s2129_s21, %s1378_s22  }
  0x33   : > { %p239_p9 = scmp.lt.s32.totalorder %s1374_s20, 3  ;;  %s1059_s24 = sshll.u32 %s1474_s5, 4 }
  0x34   : > { %s1094_s25 = sshll.u32 %s1370_s19, 8  ;;  %p2136_p11 = scmp.ge.s32.totalorder %s1374_s20, 1 }
  0x35   : > { %s1535_s8 = scalar_lea.hbm %s2124_s1, %s1094_s25  ;;  %s222_s9 = scalar_lea.vmem [#allocation5], %s1059_s24 }
  0x36   : > { %p1528_p12 = pnand %p2136_p11, %p239_p9  ;;  %s231_s11 = sshll.u32 %s222_s9, 4  ;;  %s1537_s11 = int_to_ptr.vmem [resolvable:$true] %s231_s11 }
  0x37   : > { %s219_s10 = scalar_lea.sflag [#allocation6], %s1474_s5  ;;  %s1226_s12 = scalar_lea.hbm %s1535_s8, 256 }
  0x38   : > { %p1227_p1 = scmp.ne.s32.totalorder %s1535_s8, %s1226_s12  ;;  %s1231_s25 = scalar_lea.hbm %s2124_s1, 512 }
  0x39   : > { %p1232_p2 = scmp.lt.u32.totalorder %s1535_s8, %s2124_s1  ;;  %p1233_p5 = scmp.lt.u32.totalorder %s1231_s25, %s1226_s12 }
  0x3a   : > { %p1229_p6 = pnand %p1227_p1, %p1198_p3  ;;  %p1235_p7 = scmp.lt.u32.totalorder %s1226_s12, %s1535_s8 }
  0x3b   : > { %p1234_p4 = por %p1233_p5, %p1232_p2 }
  0x3c   : > { %p1230_p13 = pneg %p1229_p6 }
  0x3d   : > { %p1236_p10 = por %p1235_p7, %p1234_p4 }
  0x3f   : > { %p1237_p9 = pnand %p1236_p10, %p1230_p13 }
  0x41   : > { %1240 = shalt.err (!%p1237_p9)
}
  0x42   : > { %s1241_s24 = scalar_lea.vmem %s1537_s11, 256  ;;  %s1379_s21 = smov [#allocation5]  }
  0x43   : > { %p1242_p11 = scmp.ne.s32.totalorder %s1537_s11, %s1241_s24  ;;  %s1246_s9 = sshll.u32 %s1379_s21, 4  ;;  %s1247_s9 = int_to_ptr.vmem [resolvable:$false] %s1246_s9 }
  0x44   : > { %s1248_s14 = scalar_lea.vmem %s1247_s9, 512  ;;  %p1249_p8 = scmp.lt.s32.totalorder %s1537_s11, %s1247_s9 }
  0x45   : > { %p1244_p1 = pnand %p1242_p11, %p1198_p3  ;;  %p1250_p2 = scmp.lt.s32.totalorder %s1248_s14, %s1241_s24 }
  0x47   : > { %p1245_p6 = pneg %p1244_p1  ;;  %p1251_p5 = por %p1250_p2, %p1249_p8 }
  0x49   : > { %p1252_p4 = pnand %p1251_p5, %p1245_p6 }
  0x4b   : > { %1255 = shalt.err (!%p1252_p4)
}
  0x4c   : > { %s2138_s12 = smov 128   ;;  %243 = sbr.rel (%p1528_p12) target bundleno = 330 (0x14a), region = 28 }
  0x4d   : > { %1110 = dma.hbm_to_vmem [thread:$0]  (!%p1487_p0), %s1535_s8, 256, %s1537_s11, %s219_s10, %s2138_s12, %s2138_s12, %s1378_s22  }
  0x4e   : > { %s1571_s25 = sand.u32 (!%p1528_p12), 1, %s1358_s16   ;;  %p2139_p8 = scmp.ne.s32.totalorder (!%p1528_p12), %s2132_s27, 0 }
  0x4f   : > { %s1063_s6 = sshll.u32 (!%p1528_p12), %s1571_s25, 6  ;;  %s246_s7 = scalar_lea.sflag (!%p1528_p12), [#allocation3], %s1571_s25 }
  0x50   : > { %s1575_s13 = scalar_lea.vmem (!%p1528_p12), [#allocation2], %s1063_s6 }
  0x53   : > { %1337 = dma.done.wait (%p2139_p8), %s246_s7, 1024  }
  0x54   : > { %1339 = vsyncadd (%p2139_p8), %s246_s7, 4294966272  ;;  %s1064_s5 = sshll.u32 %s1571_s25, 4  ;;  %s255_s22 = scalar_lea.sflag [#allocation6], %s1571_s25 }
  0x55   : > { %s258_s26 = scalar_lea.vmem [#allocation5], %s1064_s5 }
  0x56   : > { %1341 = dma.done.wait (%p2139_p8), %s255_s22, 256  }
  0x57   : > { %1343 = vsyncadd (%p2139_p8), %s255_s22, 4294967040  ;;  %p300_p0 = scmp.lt.s32.totalorder %s1366_s18, 1  ;;  %vm339_vm0 = vcmask 130048   ;;  %v1380_v0 = vmov 0.0   ;;  %v1607_v1 = vld [vmem:[%s1575_s13 + $0x8] sm:$0xff]  ;;  %v1610_v2 = vld [vmem:[%s1575_s13 + $0x18] sm:$0xff] }
  0x58   : > { %v1613_v3 = vld [vmem:[%s1575_s13 + $0x28] sm:$0xff]  ;;  %v1616_v4 = vld [vmem:[%s1575_s13 + $0x38] sm:$0xff]  ;;  %v347_v6 = vsel %vm339_vm0, %v1607_v1, -inf  ;;  %v348_v7 = vsel %vm339_vm0, %v1610_v2, -inf  ;;  %v1627_v9 = vld [vmem:[%s1575_s13] sm:$0xff]  ;;  %v1381_v25 = vmov 4  }
  0x59   : > { %s301_s8 = scalar_select %p300_p0, %s1366_s18, 1  ;;  %v1618_v5 = vld [vmem:[%s258_s26 + $0x8] sm:$0xff]  ;;  %v349_v8 = vsel %vm339_vm0, %v1613_v3, -inf  ;;  %v351_v11 = vsel %vm339_vm0, %v1616_v4, -inf  ;;  %v1633_v12 = vld [vmem:[%s1575_s13 + $0x10] sm:$0xff]  ;;  %v1636_v13 = vld [vmem:[%s1575_s13 + $0x20] sm:$0xff] }
  0x5a   : > { %vm316_vm1 = vcmp.eq.s32.totalorder %v1618_v5, 0  ;;  %v350_v10 = vmax.f32 %v347_v6, %v349_v8  ;;  %v1639_v14 = vld [vmem:[%s1575_s13 + $0x30] sm:$0xff]  ;;  %v352_v15 = vmax.f32 %v348_v7, %v351_v11  ;;  %v340_v17 = vsel %vm339_vm0, %v1627_v9, -inf  ;;  %s1065_s27 = sshll.u32 %s1571_s25, 2  ;;  %s1089_s9 = sshll.u32 %s1366_s18, 6 }
  0x5b   : > { %s1095_s11 = sshll.u32 %s301_s8, 5  ;;  %v1641_v16 = vld [vmem:[%s258_s26] sm:$0xff]  ;;  %v341_v18 = vsel %vm339_vm0, %v1633_v12, -inf  ;;  %v342_v19 = vsel %vm339_vm0, %v1636_v13, -inf  ;;  %v344_v20 = vsel %vm339_vm0, %v1639_v14, -inf  ;;  %v1652_v22 = vsel %vm316_vm1, 1.0, %v1380_v0  ;;  %s2017_s13 = scalar_lea.hbm %s2125_s2, %s1089_s9 }
  0x5c   : > { %s1592_s21 = scalar_lea.vmem %s2127_s4, %s1095_s11  ;;  %v353_v21 = vmax.f32 %v350_v10, %v352_v15  ;;  %vm315_vm2 = vcmp.eq.s32.totalorder %v1641_v16, 0  ;;  %v343_v23 = vmax.f32 %v340_v17, %v342_v19  ;;  %v345_v24 = vmax.f32 %v341_v18, %v344_v20  ;;  %s283_s14 = scalar_lea.vmem [#allocation7], %s1065_s27 }
  0x5d   : > { %562 = vst.msk [vmem:[%s1592_s21 + $0x18] sm:$0xff] %vm339_vm0, %v1380_v0  ;;  %559 = vst.msk [vmem:[%s1592_s21] sm:$0xff] %vm339_vm0, %v1380_v0  ;;  %v1681_v43 = vsel %vm315_vm2, 1.0, %v1380_v0  ;;  %v511_v46 = vsel %vm339_vm0, %v1652_v22, 0.0  ;;  %vm318_vm1 = vcmp.eq.s32.totalorder %v1618_v5, 1  ;;  %s869_s12 = sshll.u32 %s283_s14, 4  ;;  %s2019_s12 = int_to_ptr.vmem [resolvable:$true] %s869_s12 }
  0x5e   : > { %560 = vst.msk [vmem:[%s1592_s21 + $0x8] sm:$0xff] %vm339_vm0, %v1380_v0  ;;  %561 = vst.msk [vmem:[%s1592_s21 + $0x10] sm:$0xff] %vm339_vm0, %v1380_v0  ;;  %vm605_vm3 = vcmp.eq.f32.partialorder %v1607_v1, %v353_v21  ;;  %vm607_vm4 = vcmp.eq.f32.partialorder %v1610_v2, %v353_v21  ;;  %vm609_vm5 = vcmp.eq.f32.partialorder %v1613_v3, %v353_v21  ;;  %v510_v48 = vsel %vm339_vm0, %v1681_v43, 0.0  ;;  %s845_s5 = scalar_lea.sflag [#allocation4], %s1571_s25  ;;  %s1256_s22 = scalar_lea.vmem %s2019_s12, 64 }
  0x5f   : > { %vm611_vm6 = vcmp.eq.f32.partialorder %v1616_v4, %v353_v21  ;;  %v613_v26 = vsel %vm605_vm3, 0, %v1381_v25  ;;  %v615_v27 = vsel %vm607_vm4, 1, %v1381_v25  ;;  %v617_v28 = vsel %vm609_vm5, 2, %v1381_v25  ;;  %p1257_p3 = scmp.ne.s32.totalorder %s2019_s12, %s1256_s22  ;;  %p2140_p12 = scmp.ne.s32.totalorder %s2133_s28, 0 }
  0x60   : > { %v619_v29 = vsel %vm611_vm6, 3, %v1381_v25  ;;  %v630_v30 = vsel %vm339_vm0, %v613_v26, 2147483647  ;;  %v631_v31 = vsel %vm339_vm0, %v615_v27, 2147483647  ;;  %v1663_v33 = vsub.f32 %v1607_v1, %v353_v21  ;;  %s1382_s26 = smov [#allocation7]  }
  0x61   : > { %v632_v32 = vsel %vm339_vm0, %v617_v28, 2147483647  ;;  %v635_v34 = vsel %vm339_vm0, %v619_v29, 2147483647  ;;  %v1667_v35 = vsub.f32 %v1610_v2, %v353_v21  ;;  %v1670_v36 = vsub.f32 %v1613_v3, %v353_v21  ;;  %p1258_p13 = pnand %p1257_p3, %p2140_p12  ;;  %s1260_s8 = sshll.u32 %s1382_s26, 4  ;;  %s1261_s8 = int_to_ptr.vmem [resolvable:$false] %s1260_s8 }
  0x62   : > { %vm633_vm7 = vcmp.lt.s32.totalorder %v630_v30, %v632_v32  ;;  %vm636_vm8 = vcmp.lt.s32.totalorder %v631_v31, %v635_v34  ;;  %v1673_v38 = vsub.f32 %v1616_v4, %v353_v21  ;;  %v364_v39 = vmul.f32 1.442695, %v1663_v33  ;;  %s1262_s11 = scalar_lea.vmem %s1261_s8, 128  ;;  %p1263_p10 = scmp.lt.s32.totalorder %s2019_s12, %s1261_s8 }
  0x63   : > { %v634_v37 = vsel %vm633_vm7, %v630_v30, %v632_v32  ;;  %v637_v40 = vsel %vm636_vm8, %v631_v31, %v635_v34  ;;  %v368_v41 = vmul.f32 1.442695, %v1667_v35  ;;  %v372_v42 = vmul.f32 1.442695, %v1670_v36  ;;  %p1259_p7 = pneg %p1258_p13  ;;  %p1264_p9 = scmp.lt.s32.totalorder %s1262_s11, %s1256_s22 }
  0x64   : > { %vm638_vm9 = vcmp.lt.s32.totalorder %v634_v37, %v637_v40  ;;  %1172 = vpow2.f32 %v364_v39  ;;  %v376_v44 = vmul.f32 1.442695, %v1673_v38  ;;  %v346_v45 = vmax.f32 %v343_v23, %v345_v24 }
  0x65   : > { %v1686_v47 = vsel %vm638_vm9, %v634_v37, %v637_v40  ;;  %1174 = vpow2.f32 %v368_v41  ;;  %v512_v53 = vadd.f32 %v511_v46, %v510_v48  ;;  %v1725_v19 = vsel %vm318_vm1, 1.0, %v1380_v0  ;;  %p1265_p11 = por %p1264_p9, %p1263_p10 }
  0x66   : > { %vm641_vm10 = vcmp.ne.s32.totalorder %v1686_v47, %v1618_v5  ;;  %1176 = vpow2.f32 %v372_v42  ;;  %vm604_vm11 = vcmp.eq.f32.partialorder %v1627_v9, %v346_v45  ;;  %vm606_vm12 = vcmp.eq.f32.partialorder %v1633_v12, %v346_v45 }
  0x67   : > { %v1695_v49 = vsel %vm641_vm10, 1.0, %v1380_v0  ;;  %1178 = vpow2.f32 %v376_v44  ;;  %vm608_vm13 = vcmp.eq.f32.partialorder %v1636_v13, %v346_v45  ;;  %vm610_vm14 = vcmp.eq.f32.partialorder %v1639_v14, %v346_v45  ;;  %p1266_p1 = pnand %p1265_p11, %p1259_p7 }
  0x68   : > { %v687_v50 = vmul.f32 %v1695_v49, %v1652_v22  ;;  %v612_v51 = vsel %vm604_vm11, 0, %v1381_v25  ;;  %v614_v52 = vsel %vm606_vm12, 1, %v1381_v25  ;;  %v616_v54 = vsel %vm608_vm13, 2, %v1381_v25 }
  0x69   : > { %v618_v55 = vsel %vm610_vm14, 3, %v1381_v25  ;;  %v620_v56 = vsel %vm339_vm0, %v612_v51, 2147483647  ;;  %v621_v58 = vsel %vm339_vm0, %v614_v52, 2147483647  ;;  %v1706_v60 = vsub.f32 %v1627_v9, %v346_v45 }
  0x6a   : > { %v774_v57 = vsel %vm339_vm0, %v687_v50, 0.0  ;;  %v622_v59 = vsel %vm339_vm0, %v616_v54, 2147483647  ;;  %v625_v61 = vsel %vm339_vm0, %v618_v55, 2147483647  ;;  %v1710_v62 = vsub.f32 %v1633_v12, %v346_v45 }
  0x6b   : > { %775 = vadd.xlane.f32.xlu1 %v774_v57  ;;  %vm623_vm15 = vcmp.lt.s32.totalorder %v620_v56, %v622_v59  ;;  %vm626_vm2 = vcmp.lt.s32.totalorder %v621_v58, %v625_v61  ;;  %v1714_v6 = vsub.f32 %v1636_v13, %v346_v45  ;;  %v1717_v7 = vsub.f32 %v1639_v14, %v346_v45 }
  0x6c   : > { %v624_v63 = vsel %vm623_vm15, %v620_v56, %v622_v59  ;;  %v627_v8 = vsel %vm626_vm2, %v621_v58, %v625_v61  ;;  %v362_v10 = vmul.f32 1.442695, %v1706_v60  ;;  %v366_v11 = vmul.f32 1.442695, %v1710_v62 }
  0x6d   : > { %v513_v17 = vrot.slane %v512_v53, 4  ;;  %vm628_vm3 = vcmp.lt.s32.totalorder %v624_v63, %v627_v8  ;;  %v370_v18 = vmul.f32 1.442695, %v1714_v6  ;;  %v374_v24 = vmul.f32 1.442695, %v1717_v7 }
  0x6e   : > { %v1721_v15 = vpop.eup %1172  ;;  %v1731_v23 = vsel %vm628_vm3, %v624_v63, %v627_v8  ;;  %1180 = vpow2.f32 %v362_v10  ;;  %vm317_vm5 = vcmp.eq.s32.totalorder %v1641_v16, 1  ;;  %vm320_vm6 = vcmp.eq.s32.totalorder %v1618_v5, 2 }
  0x6f   : > { %v1727_v20 = vpop.eup %1174  ;;  %v385_v21 = vsel %vm339_vm0, %v1721_v15, 0.0  ;;  %vm640_vm4 = vcmp.ne.s32.totalorder %v1731_v23, %v1641_v16  ;;  %1182 = vpow2.f32 %v366_v11  ;;  %v514_v32 = vadd.f32 %v513_v17, %v512_v53 }
  0x70   : > { %v1734_v25 = vpop.eup %1176  ;;  %v386_v26 = vsel %vm339_vm0, %v1727_v20, 0.0  ;;  %v1746_v30 = vsel %vm640_vm4, 1.0, %v1380_v0  ;;  %1184 = vpow2.f32 %v370_v18  ;;  %v520_v39 = vsel %vm339_vm0, %v1725_v19, 0.0 }
  0x71   : > { %v1741_v27 = vpop.eup %1178  ;;  %v387_v28 = vadd.f32 %v386_v26, %v385_v21  ;;  %v388_v29 = vsel %vm339_vm0, %v1734_v25, 0.0  ;;  %v686_v34 = vmul.f32 %v1746_v30, %v1681_v43  ;;  %1186 = vpow2.f32 %v374_v24 }
  0x72   : > { %v390_v31 = vsel %vm339_vm0, %v1741_v27, 0.0  ;;  %v689_v40 = vmul.f32 %v1695_v49, %v1725_v19  ;;  %v1759_v42 = vsel %vm317_vm5, 1.0, %v1380_v0  ;;  %v1762_v44 = vsel %vm320_vm6, 1.0, %v1380_v0 }
  0x73   : > { %v389_v37 = vadd.f32 %v388_v29, %v387_v28  ;;  %v771_v41 = vsel %vm339_vm0, %v686_v34, 0.0  ;;  %v519_v48 = vsel %vm339_vm0, %v1759_v42, 0.0  ;;  %vm319_vm7 = vcmp.eq.s32.totalorder %v1641_v16, 2 }
  0x74   : > { %772 = vadd.xlane.f32.xlu0 %v771_v41  ;;  %v780_v46 = vsel %vm339_vm0, %v689_v40, 0.0  ;;  %v515_v50 = vrot.slane %v514_v32, 2  ;;  %v521_v51 = vadd.f32 %v520_v39, %v519_v48  ;;  %v688_v52 = vmul.f32 %v1746_v30, %v1759_v42 }
  0x75   : > { %v1764_v45 = vadd.f32 %v390_v31, %v389_v37  ;;  %781 = vadd.xlane.f32.xlu1 %v780_v46  ;;  %v529_v53 = vsel %vm339_vm0, %v1762_v44, 0.0  ;;  %v691_v54 = vmul.f32 %v1695_v49, %v1762_v44  ;;  %v403_v55 = vmul.f32 %v1652_v22, %v1663_v33 }
  0x76   : > { %v522_v56 = vrot.slane %v521_v51, 4  ;;  %v777_v57 = vsel %vm339_vm0, %v688_v52, 0.0  ;;  %v1781_v58 = vsel %vm319_vm7, 1.0, %v1380_v0  ;;  %v1790_v10 = vadd.f32 %v515_v50, %v514_v32 }
  0x77   : > { %1188 = vrcp.f32 %v1764_v45  ;;  %v786_v61 = vsel %vm339_vm0, %v691_v54, 0.0  ;;  %v528_v63 = vsel %vm339_vm0, %v1781_v58, 0.0  ;;  %v405_v18 = vmul.f32 %v1725_v19, %v1667_v35 }
  0x78   : > { %v1783_v59 = vpop.eup %1180  ;;  %778 = vadd.xlane.f32.xlu0 %v777_v57  ;;  %v530_v11 = vadd.f32 %v529_v53, %v528_v63  ;;  %v690_v21 = vmul.f32 %v1746_v30, %v1781_v58  ;;  %vm648_vm8 = vcmp.eq.s32.totalorder %v1731_v23, 1  ;;  %v417_v26 = vsel %vm339_vm0, %v403_v55, 0.0 }
  0x79   : > { %v1788_v8 = vpop.eup %1182  ;;  %v378_v33 = vsel %vm339_vm0, %v1783_v59, 0.0  ;;  %787 = vadd.xlane.f32.xlu1 %v786_v61  ;;  %v523_v29 = vadd.f32 %v522_v56, %v521_v51  ;;  %v1081_v31 = vsel %vm648_vm8, 1.0, %v1380_v0  ;;  %v517_v40 = vrot.slane %v1790_v10, 1 }
  0x7a   : > { %v379_v17 = vsel %vm339_vm0, %v1788_v8, 0.0  ;;  %v1801_v24 = vpop.eup %1184  ;;  %v531_v37 = vrot.slane %v530_v11, 4  ;;  %v783_v35 = vsel %vm339_vm0, %v690_v21, 0.0  ;;  %v672_v39 = vmul.f32 %v1081_v31, %v1746_v30 }
  0x7b   : > { %v380_v28 = vadd.f32 %v379_v17, %v378_v33  ;;  %v1805_v32 = vpop.eup %1186  ;;  %v381_v34 = vsel %vm339_vm0, %v1801_v24, 0.0  ;;  %v402_v48 = vmul.f32 %v1681_v43, %v1706_v60  ;;  %v418_v50 = vsel %vm339_vm0, %v405_v18, 0.0 }
  0x7c   : > { %v383_v46 = vsel %vm339_vm0, %v1805_v32, 0.0  ;;  %784 = vadd.xlane.f32.xlu0 %v783_v35  ;;  %v680_v51 = vmul.f32 %v672_v39, %v1633_v12  ;;  %vm646_vm9 = vcmp.eq.s32.totalorder %v1731_v23, 0  ;;  %vm649_vm10 = vcmp.eq.s32.totalorder %v1686_v47, 1 }
  0x7d   : > { %v382_v41 = vadd.f32 %v381_v34, %v380_v28  ;;  %v524_v53 = vrot.slane %v523_v29, 2  ;;  %v404_v54 = vmul.f32 %v1759_v42, %v1710_v62  ;;  %v1079_v55 = vsel %vm646_vm9, 1.0, %v1380_v0 }
  0x7e   : > { %v1827_v60 = vadd.f32 %v531_v37, %v530_v11  ;;  %v700_v57 = vsel %vm339_vm0, %v680_v51, 0.0  ;;  %v670_v12 = vmul.f32 %v1079_v55, %v1746_v30  ;;  %v1082_v61 = vsel %vm649_vm10, 1.0, %v1380_v0 }
  0x7f   : > { %v1820_v52 = vadd.f32 %v383_v46, %v382_v41  ;;  %v1836_v33 = vsel %vm339_vm0, %v402_v48, 0.0  ;;  %701 = vadd.xlane.f32.xlu1 %v700_v57  ;;  %v673_v18 = vmul.f32 %v1082_v61, %v1695_v49  ;;  %vm647_vm11 = vcmp.eq.s32.totalorder %v1686_v47, 0 }
  0x80   : > { %v678_v17 = vmul.f32 %v670_v12, %v1627_v9  ;;  %v1845_v21 = vadd.f32 %v418_v50, %v417_v26  ;;  %v1852_v28 = vmul.f32 %v1762_v44, %v1670_v36  ;;  %v1859_v9 = vadd.f32 %v524_v53, %v523_v29 }
  0x81   : > { %v1825_v56 = vpop.eup %1188  ;;  %1190 = vrcp.f32 %v1820_v52  ;;  %v533_v31 = vrot.slane %v1827_v60, 2  ;;  %v681_v36 = vmul.f32 %v673_v18, %v1610_v2  ;;  %v1080_v35 = vsel %vm647_vm11, 1.0, %v1380_v0 }
  0x82   : > { %v395_v63 = vmul.f32 %v1825_v56, %v1721_v15  ;;  %v397_v62 = vmul.f32 %v1825_v56, %v1727_v20  ;;  %v399_v11 = vmul.f32 %v1825_v56, %v1734_v25  ;;  %v1848_v15 = vsel %vm339_vm0, %v404_v54, 0.0 }
  0x83   : > { %v1856_v20 = vmul.f32 %v1781_v58, %v1714_v6  ;;  %v694_v26 = vsel %vm339_vm0, %v678_v17, 0.0  ;;  %vm651_vm12 = vcmp.eq.s32.totalorder %v1686_v47, 2  ;;  %v703_v29 = vsel %vm339_vm0, %v681_v36, 0.0 }
  0x84   : > { %v431_v25 = vmul.f32 %v1652_v22, %v395_v63  ;;  %v475_v34 = vsel %vm339_vm0, %v395_v63, 0.0  ;;  %v433_v37 = vmul.f32 %v1725_v19, %v397_v62  ;;  %695 = vadd.xlane.f32.xlu0 %v694_v26  ;;  %v484_v6 = vsel %vm339_vm0, %v397_v62, 0.0  ;;  %704 = vadd.xlane.f32.xlu1 %v703_v29 }
  0x85   : > { %v435_v39 = vmul.f32 %v1762_v44, %v399_v11  ;;  %v671_v22 = vmul.f32 %v1080_v35, %v1695_v49  ;;  %v1084_v41 = vsel %vm651_vm12, 1.0, %v1380_v0  ;;  %vm650_vm13 = vcmp.eq.s32.totalorder %v1731_v23, 2 }
  0x86   : > { %vm653_vm14 = vcmp.eq.s32.totalorder %v1686_v47, 3  ;;  %v675_v19 = vmul.f32 %v1084_v41, %v1695_v49  ;;  %v1083_v46 = vsel %vm650_vm13, 1.0, %v1380_v0  ;;  %v493_v48 = vsel %vm339_vm0, %v399_v11, 0.0 }
  0x87   : > { %v679_v2 = vmul.f32 %v671_v22, %v1607_v1  ;;  %v1086_v44 = vsel %vm653_vm14, 1.0, %v1380_v0  ;;  %v674_v50 = vmul.f32 %v1083_v46, %v1746_v30  ;;  %vm652_vm15 = vcmp.eq.s32.totalorder %v1731_v23, 3 }
  0x88   : > { %v677_v51 = vmul.f32 %v1086_v44, %v1695_v49  ;;  %v439_v53 = vsel %vm339_vm0, %v431_v25, 0.0  ;;  %v683_v1 = vmul.f32 %v675_v19, %v1613_v3  ;;  %v1085_v54 = vsel %vm652_vm15, 1.0, %v1380_v0 }
  0x89   : > { %v697_v47 = vsel %vm339_vm0, %v679_v2, 0.0  ;;  %v448_v57 = vsel %vm339_vm0, %v433_v37, 0.0  ;;  %v682_v12 = vmul.f32 %v674_v50, %v1636_v13  ;;  %v676_v63 = vmul.f32 %v1085_v54, %v1746_v30 }
  0x8a   : > { %698 = vadd.xlane.f32.xlu0 %v697_v47  ;;  %v685_v61 = vmul.f32 %v677_v51, %v1616_v4  ;;  %v709_v11 = vsel %vm339_vm0, %v683_v1, 0.0  ;;  %v457_v17 = vsel %vm339_vm0, %v435_v39, 0.0  ;;  %vm322_vm1 = vcmp.eq.s32.totalorder %v1618_v5, 3 }
  0x8b   : > { %v1887_v55 = vpop.eup %1190  ;;  %710 = vadd.xlane.f32.xlu1 %v709_v11  ;;  %v706_v13 = vsel %vm339_vm0, %v682_v12, 0.0  ;;  %v684_v18 = vmul.f32 %v676_v63, %v1639_v14  ;;  %v420_v51 = vsel %vm339_vm0, %v1852_v28, 0.0  ;;  %v526_v47 = vrot.slane %v1859_v9, 1 }
  0x8c   : > { %v394_v23 = vmul.f32 %v1887_v55, %v1783_v59  ;;  %v396_v62 = vmul.f32 %v1887_v55, %v1788_v8  ;;  %v398_v3 = vmul.f32 %v1887_v55, %v1801_v24  ;;  %v715_v4 = vsel %vm339_vm0, %v685_v61, 0.0 }
  0x8d   : > { %v1076_v5 = vsel %vm322_vm1, 1.0, %v1380_v0  ;;  %v401_v1 = vmul.f32 %v1825_v56, %v1741_v27  ;;  %1192 = vlog2.f32 %v1764_v45  ;;  %v1932_v28 = vadd.f32 %v517_v40, %v1790_v10 }
  0x8e   : > { %v430_v25 = vmul.f32 %v1681_v43, %v394_v23  ;;  %v474_v59 = vsel %vm339_vm0, %v394_v23, 0.0  ;;  %v432_v8 = vmul.f32 %v1759_v42, %v396_v62  ;;  %v483_v26 = vsel %vm339_vm0, %v396_v62, 0.0  ;;  %707 = vadd.xlane.f32.xlu0 %v706_v13 }
  0x8f   : > { %v476_v24 = vadd.f32 %v475_v34, %v474_v59  ;;  %v485_v37 = vadd.f32 %v484_v6, %v483_v26  ;;  %v434_v36 = vmul.f32 %v1781_v58, %v398_v3  ;;  %v492_v35 = vsel %vm339_vm0, %v398_v3, 0.0  ;;  %716 = vadd.xlane.f32.xlu1 %v715_v4 }
  0x90   : > { %v438_v39 = vsel %vm339_vm0, %v430_v25, 0.0  ;;  %v447_v22 = vsel %vm339_vm0, %v432_v8, 0.0  ;;  %v494_v14 = vadd.f32 %v493_v48, %v492_v35  ;;  %v712_v43 = vsel %vm339_vm0, %v684_v18, 0.0 }
  0x91   : > { %v440_v29 = vadd.f32 %v439_v53, %v438_v39  ;;  %v477_v41 = vrot.slane %v476_v24, 4  ;;  %v449_v2 = vadd.f32 %v448_v57, %v447_v22  ;;  %v486_v42 = vrot.slane %v485_v37, 4 }
  0x92   : > { %v412_v34 = vadd.f32 %v1848_v15, %v1836_v33  ;;  %v456_v58 = vsel %vm339_vm0, %v434_v36, 0.0  ;;  %v495_v6 = vrot.slane %v494_v14, 4  ;;  %v534_v48 = vadd.f32 %v533_v31, %v1827_v60  ;;  %713 = vadd.xlane.f32.xlu0 %v712_v43 }
  0x93   : > { %v441_v19 = vrot.slane %v440_v29, 4  ;;  %v478_v46 = vadd.f32 %v477_v41, %v476_v24  ;;  %v450_v44 = vrot.slane %v449_v2, 4  ;;  %v487_v50 = vadd.f32 %v486_v42, %v485_v37 }
  0x94   : > { %v413_v33 = vsel %vm339_vm0, %v1856_v20, 0.0  ;;  %v458_v15 = vadd.f32 %v457_v17, %v456_v58  ;;  %v496_v60 = vadd.f32 %v495_v6, %v494_v14  ;;  %v535_v31 = vrot.slane %v534_v48, 1 }
  0x95   : > { %v442_v53 = vadd.f32 %v441_v19, %v440_v29  ;;  %v451_v54 = vadd.f32 %v450_v44, %v449_v2  ;;  %v479_v20 = vrot.slane %v478_v46, 2  ;;  %v409_v12 = vmul.f32 %v1076_v5, %v1673_v38 }
  0x96   : > { %v459_v57 = vrot.slane %v458_v15, 4  ;;  %v488_v63 = vrot.slane %v487_v50, 2  ;;  %v421_v23 = vadd.f32 %v420_v51, %v1845_v21  ;;  %v693_v27 = vmul.f32 %v1695_v49, %v1076_v5 }
  0x97   : > { %v443_v61 = vrot.slane %v442_v53, 2  ;;  %v527_v56 = vadd.f32 %v526_v47, %v1859_v9  ;;  %v414_v62 = vadd.f32 %v413_v33, %v412_v34  ;;  %v437_v45 = vmul.f32 %v1076_v5, %v401_v1  ;;  %v1193_v22 = vpop.eup %1192 }
  0x98   : > { %v460_v3 = vadd.f32 %v459_v57, %v458_v15  ;;  %v452_v11 = vrot.slane %v451_v54, 2  ;;  %v497_v17 = vrot.slane %v496_v60, 2  ;;  %v792_v10 = vsel %vm339_vm0, %v693_v27, 0.0 }
  0x99   : > { %vm321_vm2 = vcmp.eq.s32.totalorder %v1641_v16, 3  ;;  %v480_v40 = vadd.f32 %v479_v20, %v478_v46  ;;  %v536_v13 = vadd.f32 %v535_v31, %v534_v48  ;;  %v422_v38 = vsel %vm339_vm0, %v409_v12, 0.0  ;;  %793 = vadd.xlane.f32.xlu1 %v792_v10 }
  0x9a   : > { %v538_v4 = vsel %vm339_vm0, %v1076_v5, 0.0  ;;  %v444_v21 = vadd.f32 %v443_v61, %v442_v53  ;;  %v489_v49 = vadd.f32 %v488_v63, %v487_v50  ;;  %v1075_v9 = vsel %vm321_vm2, 1.0, %v1380_v0 }
  0x9b   : > { %v400_v18 = vmul.f32 %v1887_v55, %v1805_v32  ;;  %v461_v25 = vrot.slane %v460_v3, 2  ;;  %v466_v59 = vsel %vm339_vm0, %v437_v45, 0.0  ;;  %v502_v8 = vsel %vm339_vm0, %v401_v1, 0.0 }
  0x9c   : > { %v537_v16 = vsel %vm339_vm0, %v1075_v9, 0.0  ;;  %v453_v26 = vadd.f32 %v452_v11, %v451_v54  ;;  %v498_v24 = vadd.f32 %v497_v17, %v496_v60  ;;  %v692_v36 = vmul.f32 %v1746_v30, %v1075_v9 }
  0x9d   : > { %v539_v37 = vadd.f32 %v538_v4, %v537_v16  ;;  %v481_v35 = vrot.slane %v480_v40, 1  ;;  %1194 = vlog2.f32 %v1820_v52  ;;  %v436_v39 = vmul.f32 %v1075_v9, %v400_v18  ;;  %v563_v16 = vld [vmem:[%s1592_s21] sm:$0xf] }
  0x9e   : > { %v501_v0 = vsel %vm339_vm0, %v400_v18, 0.0  ;;  %v445_v32 = vrot.slane %v444_v21, 1  ;;  %v490_v55 = vrot.slane %v489_v49, 1  ;;  %v789_v43 = vsel %vm339_vm0, %v692_v36, 0.0  ;;  %v578_v18 = vld [vmem:[%s1592_s21 + $0x8] sm:$0xf] }
  0x9f   : > { %v540_v14 = vrot.slane %v539_v37, 4  ;;  %v462_v29 = vadd.f32 %v461_v25, %v460_v3  ;;  %790 = vadd.xlane.f32.xlu0 %v789_v43  ;;  %v408_v41 = vmul.f32 %v1075_v9, %v1717_v7  ;;  %v465_v2 = vsel %vm339_vm0, %v436_v39, 0.0 }
  0xa0   : > { %v503_v42 = vadd.f32 %v502_v8, %v501_v0  ;;  %v454_v30 = vrot.slane %v453_v26, 1  ;;  %v423_v34 = vadd.f32 %v422_v38, %v421_v23  ;;  %v467_v52 = vadd.f32 %v466_v59, %v465_v2 }
  0xa1   : > { %v541_v58 = vadd.f32 %v540_v14, %v539_v37  ;;  %v482_v6 = vadd.f32 %v481_v35, %v480_v40  ;;  %v499_v19 = vrot.slane %v498_v24, 1  ;;  %v427_v46 = vmul.f32 0.6931472, %v1193_v22  ;;  %v600_v14 = vld [vmem:[%s1592_s21 + $0x18] sm:$0x1] }
  0xa2   : > { %v504_v44 = vrot.slane %v503_v42, 4  ;;  %v446_v48 = vadd.f32 %v445_v32, %v444_v21  ;;  %v491_v50 = vadd.f32 %v490_v55, %v489_v49  ;;  %v468_v33 = vrot.slane %v467_v52, 4 }
  0xa3   : > { %v542_v51 = vrot.slane %v541_v58, 2  ;;  %v463_v15 = vrot.slane %v462_v29, 1  ;;  %v415_v53 = vsel %vm339_vm0, %v408_v41, 0.0  ;;  %vm568_vm3 = vcmask 1041409  }
  0xa4   : > { %v505_v47 = vadd.f32 %v504_v44, %v503_v42  ;;  %v455_v7 = vadd.f32 %v454_v30, %v453_v26  ;;  %v469_v1 = vadd.f32 %v468_v33, %v467_v52  ;;  %v594_v54 = vsel %vm568_vm3, %v527_v56, %v1932_v28  ;;  %v589_v56 = vld [vmem:[%s1592_s21 + $0x10] sm:$0xf] }
  0xa5   : > { %v543_v5 = vadd.f32 %v542_v51, %v541_v58  ;;  %v500_v57 = vadd.f32 %v499_v19, %v498_v24  ;;  %v429_v60 = vsub.f32 %v427_v46, %v423_v34  ;;  %v416_v12 = vadd.f32 %v415_v53, %v414_v62 }
  0xa6   : > { %v506_v20 = vrot.slane %v505_v47, 2  ;;  %v470_v61 = vrot.slane %v469_v1, 2  ;;  %vm570_vm4 = vcmask 1042434   ;;  %v464_v23 = vadd.f32 %v463_v15, %v462_v29 }
  0xa7   : > { %v544_v31 = vrot.slane %v543_v5, 1  ;;  %v1195_v63 = vpop.eup %1194  ;;  %v583_v3 = vsel %vm568_vm3, %v491_v50, %v482_v6  ;;  %v595_v45 = vsel %vm570_vm4, %v536_v13, %v594_v54  ;;  %v569_v28 = vsel %vm568_vm3, %v455_v7, %v446_v48 }
  0xa8   : > { %v507_v27 = vadd.f32 %v506_v20, %v505_v47  ;;  %v425_v17 = vmul.f32 0.6931472, %v1195_v63  ;;  %v471_v10 = vadd.f32 %v470_v61, %v469_v1  ;;  %v547_v40 = vsel %vm339_vm0, %v429_v60, 0.0 }
  0xa9   : > { %v545_v11 = vadd.f32 %v544_v31, %v543_v5  ;;  %vm572_vm5 = vcmask 1043459   ;;  %v584_v21 = vsel %vm570_vm4, %v500_v57, %v583_v3  ;;  %v571_v9 = vsel %vm570_vm4, %v464_v23, %v569_v28 }
  0xaa   : > { %v508_v62 = vrot.slane %v507_v27, 1  ;;  %v428_v38 = vsub.f32 %v425_v17, %v416_v12  ;;  %v472_v4 = vrot.slane %v471_v10, 1  ;;  %vm576_vm6 = vcmask 125952  }
  0xab   : > { %v596_v49 = vsel %vm572_vm5, %v545_v11, %v595_v45  ;;  %v726_v52 = vlaneseq  ;;  %vm737_vm7 = vcmask 130112  }
  0xac   : > { %v509_v13 = vadd.f32 %v508_v62, %v507_v27  ;;  %v598_v25 = vadd.f32 %v596_v49, %v589_v56  ;;  %v473_v59 = vadd.f32 %v472_v4, %v471_v10  ;;  %v546_v8 = vsel %vm339_vm0, %v428_v38, 0.0 }
  0xad   : > { %v548_v26 = vadd.f32 %v547_v40, %v546_v8  ;;  %vm602_vm0 = vcmask 122880   ;;  %v727_v19 = vand.u32 127, %v726_v52  ;;  %v729_v44 = vshrl.u32 %v726_v52, 7 }
  0xae   : > { %v585_v24 = vsel %vm572_vm5, %v509_v13, %v584_v21  ;;  %599 = vst.msk [vmem:[%s1592_s21 + $0x10] sm:$0xf] %vm576_vm6, %v598_v25  ;;  %v573_v37 = vsel %vm572_vm5, %v473_v59, %v571_v9 }
  0xaf   : > { %v587_v36 = vadd.f32 %v585_v24, %v578_v18  ;;  %v549_v35 = vrot.slane %v548_v26, 4  ;;  %v575_v39 = vadd.f32 %v573_v37, %v563_v16  ;;  %v732_v48 = vadd.s32 4294967288, %v727_v19 }
  0xb0   : > { %v1992_v53 = vsub.s32 %v727_v19, %v729_v44 }
  0xb1   : > { %588 = vst.msk [vmem:[%s1592_s21 + $0x8] sm:$0xf] %vm576_vm6, %v587_v36  ;;  %v550_v0 = vadd.f32 %v549_v35, %v548_v26  ;;  %577 = vst.msk [vmem:[%s1592_s21] sm:$0xf] %vm576_vm6, %v575_v39  ;;  %v1990_v33 = vsub.s32 %v732_v48, %v729_v44 }
  0xb3   : > { %v551_v22 = vrot.slane %v550_v0, 2 }
  0xb5   : > { %v552_v32 = vadd.f32 %v551_v22, %v550_v0 }
  0xb7   : > { %v553_v55 = vrot.slane %v552_v32, 1 }
  0xb9   : > { %v554_v43 = vadd.f32 %v553_v55, %v552_v32 }
  0xbb   : > { %v601_v29 = vadd.f32 %v600_v14, %v554_v43 }
  0xbd   : > { %603 = vst.msk [vmem:[%s1592_s21 + $0x18] sm:$0x1] %vm602_vm0, %v601_v29 }
  0xf8   : > { %v1978_v41 = vpop.xlane.xlu1 %775 }
 0x101   : > { %v1980_v2 = vpop.xlane.xlu0 %772 }
 0x102   : > { %v1982_v42 = vpop.xlane.xlu1 %781 }
 0x105   : > { %v1984_v30 = vpop.xlane.xlu0 %778 }
 0x106   : > { %v1986_v34 = vpop.xlane.xlu1 %787 }
 0x109   : > { %v1988_v58 = vpop.xlane.xlu0 %784 }
 0x10c   : > { %v702_v6 = vpop.xlane.xlu1 %701 }
 0x10d   : > { %v742_v54 = vrot.slane %v702_v6, %v1992_v53 }
 0x111   : > { %v696_v46 = vpop.xlane.xlu0 %695  ;;  %v705_v50 = vpop.xlane.xlu1 %704 }
 0x112   : > { %v746_v47 = vrot.slane %v705_v50, %v1990_v33  ;;  %v731_v57 = vrot.slane %v696_v46, %v1992_v53 }
 0x114   : > { %v747_v31 = vsel %vm737_vm7, %v746_v47, %v742_v54 }
 0x117   : > { %v699_v51 = vpop.xlane.xlu0 %698 }
 0x118   : > { %v711_v15 = vpop.xlane.xlu1 %710  ;;  %v736_v7 = vrot.slane %v699_v51, %v1990_v33 }
 0x119   : > { %v755_v5 = vrot.slane %v711_v15, %v1990_v33 }
 0x11a   : > { %v738_v12 = vsel %vm737_vm7, %v736_v7, %v731_v57 }
 0x11b   : > { %v708_v1 = vpop.xlane.xlu0 %707  ;;  %v766_v3 = vsel %vm568_vm3, %v747_v31, %v738_v12 }
 0x11c   : > { %v751_v60 = vrot.slane %v708_v1, %v1992_v53  ;;  %v717_v20 = vpop.xlane.xlu1 %716 }
 0x11d   : > { %v764_v61 = vrot.slane %v717_v20, %v1990_v33 }
 0x11e   : > { %v756_v63 = vsel %vm737_vm7, %v755_v5, %v751_v60 }
 0x11f   : > { %v714_v23 = vpop.xlane.xlu0 %713  ;;  %v767_v45 = vsel %vm570_vm4, %v756_v63, %v766_v3 }
 0x120   : > { %v760_v27 = vrot.slane %v714_v23, %v1992_v53 }
 0x122   : > { %v765_v11 = vsel %vm737_vm7, %v764_v61, %v760_v27 }
 0x123   : > { %v768_v17 = vsel %vm572_vm5, %v765_v11, %v767_v45 }
 0x124   : > { %770 = vst.msk [vmem:[%s283_s14] sm:$0xf] %vm576_vm6, %v768_v17 }
 0x125   : > { %1269 = shalt.err (!%p1266_p1)
}
 0x126   : > { %s1270_s10 = scalar_lea.hbm %s2017_s13, 64  ;;  %s1274_s14 = scalar_lea.hbm %s2125_s2, 128 }
 0x127   : > { %p1271_p6 = scmp.ne.s32.totalorder %s2017_s13, %s1270_s10  ;;  %p1275_p4 = scmp.lt.u32.totalorder %s2017_s13, %s2125_s2 }
 0x128   : > { %p1276_p8 = scmp.lt.u32.totalorder %s1274_s14, %s1270_s10  ;;  %p1278_p3 = scmp.lt.u32.totalorder %s1270_s10, %s2017_s13 }
 0x129   : > { %p1272_p2 = pnand %p1271_p6, %p2140_p12 }
 0x12a   : > { %p1277_p0 = por %p1276_p8, %p1275_p4 }
 0x12b   : > { %p1273_p5 = pneg %p1272_p2 }
 0x12c   : > { %p1279_p13 = por %p1278_p3, %p1277_p0 }
 0x12e   : > { %p1280_p7 = pnand %p1279_p13, %p1273_p5 }
 0x130   : > { %1283 = shalt.err (!%p1280_p7)
}
 0x131   : > { %1100 = dma.vmem_to_hbm [thread:$0]  (%p2140_p12), %s2019_s12, 64, %s2017_s13, %s845_s5   ;;  %v819_v10 = vrot.slane %v1982_v42, %v1990_v33  ;;  %v815_v28 = vrot.slane %v1984_v30, %v1992_v53  ;;  %v828_v56 = vrot.slane %v1986_v34, %v1990_v33  ;;  %v824_v40 = vrot.slane %v1988_v58, %v1992_v53  ;;  %v794_v62 = vpop.xlane.xlu1 %793  ;;  %v791_v9 = vpop.xlane.xlu0 %790 }
 0x132   : > { %v810_v38 = vrot.slane %v1978_v41, %v1990_v33  ;;  %v806_v4 = vrot.slane %v1980_v2, %v1992_v53  ;;  %v837_v49 = vrot.slane %v794_v62, %v1990_v33  ;;  %s290_s12 = scalar_lea.vmem [#allocation8], %s1065_s27  ;;  %v833_v25 = vrot.slane %v791_v9, %v1992_v53  ;;  %s2072_s26 = scalar_lea.hbm %s2126_s3, %s1089_s9 }
 0x133   : > { %v820_v21 = vsel %vm737_vm7, %v819_v10, %v815_v28  ;;  %v829_v13 = vsel %vm737_vm7, %v828_v56, %v824_v40  ;;  %s883_s13 = sshll.u32 %s290_s12, 4  ;;  %s850_s27 = scalar_lea.sflag [#allocation9], %s1571_s25  ;;  %s2074_s13 = int_to_ptr.vmem [resolvable:$true] %s883_s13 }
 0x134   : > { %v811_v18 = vsel %vm737_vm7, %v810_v38, %v806_v4  ;;  %v838_v16 = vsel %vm737_vm7, %v837_v49, %v833_v25  ;;  %s1284_s8 = scalar_lea.vmem %s2074_s13, 64  ;;  %s1383_s18 = smov [#allocation8]  }
 0x135   : > { %v839_v59 = vsel %vm568_vm3, %v820_v21, %v811_v18  ;;  %p1285_p10 = scmp.ne.s32.totalorder %s2074_s13, %s1284_s8  ;;  %s1288_s11 = sshll.u32 %s1383_s18, 4  ;;  %s1289_s11 = int_to_ptr.vmem [resolvable:$false] %s1288_s11 }
 0x136   : > { %v840_v8 = vsel %vm570_vm4, %v829_v13, %v839_v59  ;;  %s1290_s9 = scalar_lea.vmem %s1289_s11, 128  ;;  %p1291_p1 = scmp.lt.s32.totalorder %s2074_s13, %s1289_s11 }
 0x137   : > { %v841_v26 = vsel %vm572_vm5, %v838_v16, %v840_v8  ;;  %p1286_p9 = pnand %p1285_p10, %p2140_p12  ;;  %p1292_p6 = scmp.lt.s32.totalorder %s1290_s9, %s1284_s8 }
 0x138   : > { %843 = vst.msk [vmem:[%s290_s12] sm:$0xf] %vm576_vm6, %v841_v26 }
 0x139   : > { %p1287_p11 = pneg %p1286_p9  ;;  %p1293_p2 = por %p1292_p6, %p1291_p1 }
 0x13b   : > { %p1294_p5 = pnand %p1293_p2, %p1287_p11 }
 0x13d   : > { %1297 = shalt.err (!%p1294_p5)
}
 0x13e   : > { %s1298_s25 = scalar_lea.hbm %s2072_s26, 64  ;;  %s1302_s21 = scalar_lea.hbm %s2126_s3, 128 }
 0x13f   : > { %p1299_p4 = scmp.ne.s32.totalorder %s2072_s26, %s1298_s25  ;;  %p1303_p3 = scmp.lt.u32.totalorder %s2072_s26, %s2126_s3 }
 0x140   : > { %p1304_p13 = scmp.lt.u32.totalorder %s1302_s21, %s1298_s25  ;;  %p1306_p10 = scmp.lt.u32.totalorder %s1298_s25, %s2072_s26 }
 0x141   : > { %p1300_p8 = pnand %p1299_p4, %p2140_p12 }
 0x142   : > { %p1305_p7 = por %p1304_p13, %p1303_p3 }
 0x143   : > { %p1301_p0 = pneg %p1300_p8 }
 0x144   : > { %p1307_p9 = por %p1306_p10, %p1305_p7 }
 0x146   : > { %p1308_p11 = pnand %p1307_p9, %p1301_p0 }
 0x148   : > { %1311 = shalt.err (!%p1308_p11)
}
 0x149   : > { %1101 = dma.vmem_to_hbm [thread:$0]  (%p2140_p12), %s2074_s13, 64, %s2072_s26, %s850_s27  }
 0x14a PF: > { %s898_s7 = sand.u32 1, %s1354_s15   ;;  %p2141_p1 = scmp.ne.s32.totalorder %s2134_s30, 0 }
 0x14b   : > { %p2142_p6 = scmp.ge.s32.totalorder %s1374_s20, 2  ;;  %s899_s12 = scalar_lea.sflag [#allocation4], %s898_s7 }
 0x14d   : > { %p1112_p2 = pnand %p2142_p6, %p2141_p1 }
 0x14f   : > { %1345 = dma.done.wait (!%p1112_p2), %s899_s12, 64  }
 0x150   : > { %1347 = vsyncadd (!%p1112_p2), %s899_s12, 4294967232  ;;  %s908_s5 = scalar_lea.sflag [#allocation9], %s898_s7 }
 0x151   : > { %1349 = dma.done.wait (!%p1112_p2), %s908_s5, 64  }
 0x152   : > { %1351 = vsyncadd (!%p1112_p2), %s908_s5, 4294967232  ;;  %s27_s20 = sadd.s32 1, %s1374_s20   ;;  %s2143_s15 = smov %s1358_s16 }
 0x153   : > { %p24_p5 = scmp.ge.s32.totalorder %s27_s20, 4   ;;  %s2144_s16 = smov %s1362_s17 }
 0x154   : > { %s2145_s17 = smov %s1465_s29  ;;  %s2146_s18 = smov %s1370_s19 }
 0x155   : > { %s2147_s19 = smov %s2149_s23  ;;  %26 = sbr.rel (!%p24_p5) target bundleno = 10 (0xa), region = 119 }
 0x15c   :  { %921 = vsyncpa [#allocation3], 1 }
 0x15d   :  { %923 = vsyncpa [#allocation3 + $0x1], 1 }
 0x15e   :  { %924 = vsyncpa [#allocation6], 1 }
 0x15f   :  { %926 = vsyncpa [#allocation6 + $0x1], 1 }
 0x160   :  { %927 = vsyncpa [#allocation4], 1 }
 0x161   :  { %929 = vsyncpa [#allocation4 + $0x1], 1 }
 0x162   :  { %930 = vsyncpa [#allocation9], 1 }
 0x163   :  { %932 = vsyncpa [#allocation9 + $0x1], 1 }

</bundles_post_ra>
